<compile_context>
chip_gen: v7x
topology: tpu7x:2x2x1
jax: 0.10.0
libtpu: 0.0.40
codegen_flags: <defaults>
</compile_context>

<pallas_src>
import jax
import jax.numpy as jnp
from jax import lax
from jax.experimental import pallas as pl
from jax.experimental.pallas import tpu as pltpu


def _round_up(n, m):
    return ((n + m - 1) // m) * m


def _sigmoid(x):
    # tanh-form sigmoid: a single EUP transcendental instead of exp + divide.
    return 0.5 * (jnp.tanh(0.5 * x) + 1.0)


# --------------------- kernel 1: hoisted input projection ---------------------


def input_gates_kernel(x_ref, w_ref, b_ref, o_ref):
    o_ref[...] = (
        jnp.dot(x_ref[...].astype(jnp.bfloat16), w_ref[...],
                preferred_element_type=jnp.float32)
        + b_ref[...]
    )


def _input_gates(x_flat, w_ih, b, tile_m):
    """gates_x = x_flat @ W_ih + b as one big MXU matmul.  x_flat: [T*Bp, D] f32."""
    M, D = x_flat.shape
    H4 = w_ih.shape[1]
    cost = pl.CostEstimate(
        flops=int(2 * M * D * H4),
        transcendentals=0,
        bytes_accessed=int(4 * x_flat.size + 2 * w_ih.size + 4 * (b.size + M * H4)),
    )
    return pl.pallas_call(
        input_gates_kernel,
        out_shape=jax.ShapeDtypeStruct((M, H4), jnp.float32),
        grid=(M // tile_m,),
        in_specs=[
            pl.BlockSpec((tile_m, D), lambda i: (i, 0)),
            pl.BlockSpec((D, H4), lambda i: (0, 0)),      # weight resident in VMEM
            pl.BlockSpec((1, H4), lambda i: (0, 0)),      # bias resident
        ],
        out_specs=pl.BlockSpec((tile_m, H4), lambda i: (i, 0)),
        compiler_params=pltpu.CompilerParams(
            dimension_semantics=("parallel",),
            vmem_limit_bytes=48 << 20,
        ),
        cost_estimate=cost,
    )(x_flat, w_ih, b)


# ----------------- kernel 2: fused multi-layer LSTM + fc2 head ----------------


def make_fused_lstm_critic_kernel(num_layers, seq_len, hidden):
    L, T, H = num_layers, seq_len, hidden
    n_in = 2 + 2 * (L - 1) + 4

    def kernel(*refs):
        gx_ref = refs[0]                       # [T, tile_b, 4H] f32 (x@W_ih0 + b0, hoisted)
        w_hh0_ref = refs[1]                    # [H, 4H] bf16
        deep_refs = refs[2:2 + 2 * (L - 1)]    # per deeper layer: ([2H,4H] bf16, [1,4H] f32)
        a_ref, wh_ref, wa_ref, bfc_ref = refs[2 + 2 * (L - 1):n_in]
        q_ref = refs[n_in]                     # [tile_b, 128] lane-dense q slab
        h_scs = refs[n_in + 1:n_in + 1 + L]    # per-layer hidden carry (VMEM)
        c_scs = refs[n_in + 1 + L:n_in + 1 + 2 * L]   # per-layer cell carry (VMEM)

        # Each grid step handles one independent batch tile end-to-end: re-init state here.
        for l in range(L):
            h_scs[l][...] = jnp.zeros_like(h_scs[l])
            c_scs[l][...] = jnp.zeros_like(c_scs[l])

        def cell(gates, h_ref, c_ref):
            i = _sigmoid(gates[:, 0 * H:1 * H])
            f = _sigmoid(gates[:, 1 * H:2 * H])
            g = jnp.tanh(gates[:, 2 * H:3 * H])
            o = _sigmoid(gates[:, 3 * H:4 * H])
            c = f * c_ref[...] + i * g
            h = o * jnp.tanh(c)
            c_ref[...] = c
            h_ref[...] = h
            return h

        def step(t, carry):
            # Layer 0: precomputed x-gates + recurrent term only.
            g0 = gx_ref[t] + jnp.dot(
                h_scs[0][...].astype(jnp.bfloat16), w_hh0_ref[...],
                preferred_element_type=jnp.float32)
            x_in = cell(g0, h_scs[0], c_scs[0])
            # Deeper layers: single per-step dot with K = 2H on [h_below | h_prev].
            for l in range(1, L):
                w_cat_ref = deep_refs[2 * (l - 1)]
                b_ref = deep_refs[2 * (l - 1) + 1]
                cat = jnp.concatenate([x_in, h_scs[l][...]], axis=-1)
                g = jnp.dot(cat.astype(jnp.bfloat16), w_cat_ref[...],
                            preferred_element_type=jnp.float32) + b_ref[...]
                x_in = cell(g, h_scs[l], c_scs[l])
            return carry

        lax.fori_loop(0, T, step, 0, unroll=True)

        # fc2 (out_features == 1): VPU multiply + lane reduce on the top layer's last hidden.
        h_top = h_scs[L - 1][...]
        q = jnp.sum(h_top * wh_ref[...], axis=-1, keepdims=True)
        q = q + jnp.sum(a_ref[...] * wa_ref[...], axis=-1, keepdims=True)
        q = q + bfc_ref[...]
        q_ref[...] = jnp.broadcast_to(q, q_ref.shape)      # lane-dense, unmasked store

    return kernel


def _fused_lstm_critic(gx, w_hh0, deep, a_mat, w_h, w_a, b_fc, tile_b):
    T, Bp, H4 = gx.shape
    H = w_hh0.shape[0]
    L = 1 + len(deep)
    A = a_mat.shape[1]

    in_specs = [
        pl.BlockSpec((T, tile_b, H4), lambda nb: (0, nb, 0)),   # precomputed gates slab
        pl.BlockSpec((H, H4), lambda nb: (0, 0)),               # W_hh layer 0 (resident)
    ]
    args = [gx, w_hh0]
    for (w_cat, b) in deep:
        # NOTE: on v7x (64 MiB VMEM) with large H, these resident weights could additionally be
        # single-buffered via pipeline_mode=pl.Buffered(1); unnecessary at these sizes.
        in_specs.append(pl.BlockSpec((2 * H, H4), lambda nb: (0, 0)))
        in_specs.append(pl.BlockSpec((1, H4), lambda nb: (0, 0)))
        args.extend([w_cat, b])
    in_specs += [
        pl.BlockSpec((tile_b, A), lambda nb: (nb, 0)),          # action tile
        pl.BlockSpec((1, H), lambda nb: (0, 0)),                # fc2 weight (hidden part)
        pl.BlockSpec((1, A), lambda nb: (0, 0)),                # fc2 weight (action part)
        pl.BlockSpec((1, 1), lambda nb: (0, 0)),                # fc2 bias
    ]
    args += [a_mat, w_h, w_a, b_fc]

    flops = (2 * Bp * T * H * H4                       # layer-0 recurrent matmul
             + 2 * Bp * T * 2 * H * H4 * (L - 1)       # deeper-layer fused matmuls
             + 2 * Bp * (H + A))                       # fc2
    w_bytes = 2 * (w_hh0.size + sum(w.size for (w, _) in deep))
    cost = pl.CostEstimate(
        flops=int(flops),
        transcendentals=int(5 * Bp * T * H * L),
        bytes_accessed=int(4 * gx.size + w_bytes
                           + 4 * (a_mat.size + Bp * 128 + w_h.size + w_a.size + 1
                                  + sum(b.size for (_, b) in deep))),
    )
    return pl.pallas_call(
        make_fused_lstm_critic_kernel(L, T, H),
        out_shape=jax.ShapeDtypeStruct((Bp, 128), jnp.float32),   # lane-dense q slab
        grid=(Bp // tile_b,),
        in_specs=in_specs,
        out_specs=pl.BlockSpec((tile_b, 128), lambda nb: (nb, 0)),
        scratch_shapes=[pltpu.VMEM((tile_b, H), jnp.float32) for _ in range(2 * L)],
        compiler_params=pltpu.CompilerParams(
            dimension_semantics=("parallel",),        # batch tiles independent (megacore on v7x)
            vmem_limit_bytes=48 << 20,
        ),
        cost_estimate=cost,
    )(*args)


# ----------------------------------- wrapper ----------------------------------


def recurrent_critic_forward(s, a, params, tile_b=256):
    """s: [B, T, prod(state_shape)], a: [B, prod(action_shape)] or None. Returns Q [B, 1]."""
    s = jnp.asarray(s, jnp.float32)
    assert s.ndim == 3, "expected s of shape [batch, seq, prod(state_shape)]"
    B, T, D = s.shape
    lstm_params = params["lstm"]
    H = lstm_params[0][1].shape[0]

    if a is None:
        a_mat = jnp.zeros((B, 1), jnp.float32)          # zero action + zero weight row ==
        w_a = jnp.zeros((1, 1), jnp.float32)            # "no action concatenated"
    else:
        a_mat = jnp.asarray(a, jnp.float32).reshape(B, -1)
        w_a = params["w_a"]

    # Sublane-aligned batch tiles; >= 2 tiles whenever B > 8 so v7x can use both TensorCores.
    B8 = _round_up(B, 8)
    tb = min(tile_b, max(8, _round_up(-(-B8 // 2), 8)))
    Bp = _round_up(B8, tb)

    x = jnp.transpose(s, (1, 0, 2))                     # time-major [T, B, D]
    x = jnp.pad(x, ((0, 0), (0, Bp - B), (0, 0)))
    a_mat = jnp.pad(a_mat, ((0, Bp - B), (0, 0)))

    # Hoisted layer-0 input projection over all T*Bp rows (bias folded in).
    w_ih0, w_hh0, b0 = lstm_params[0]
    M = T * Bp
    tile_m = min(1024, M)
    while M % tile_m != 0:
        tile_m -= 8
    gx = _input_gates(x.reshape(M, D), w_ih0, b0, tile_m).reshape(T, Bp, 4 * H)

    # Deeper layers: stack [W_ih; W_hh] -> single K=2H dot per step inside the fused kernel.
    deep = [(jnp.concatenate([w_ih, w_hh], axis=0), b)
            for (w_ih, w_hh, b) in lstm_params[1:]]

    q_slab = _fused_lstm_critic(gx, w_hh0, deep, a_mat, params["w_h"], w_a,
                                params["b_fc"], tb)
    return q_slab[:B, :1]


# ----------------------------- params & reference -----------------------------


def init_params(key, state_dim, action_dim, hidden, layer_num):
    """Deterministic init mimicking torch defaults. LSTM weights stored [in, 4H] (gate order
    i, f, g, o) in bf16; biases combined (b_ih + b_hh) in f32; fc2 weight split into
    hidden / action rows, f32."""
    def u(k, shape, bound, dtype=jnp.float32):
        return jax.random.uniform(k, shape, jnp.float32, -bound, bound).astype(dtype)

    keys = jax.random.split(key, 4 * layer_num + 3)
    bound = 1.0 / float(hidden) ** 0.5
    lstm = []
    for l in range(layer_num):
        d_in = state_dim if l == 0 else hidden
        w_ih = u(keys[4 * l + 0], (d_in, 4 * hidden), bound, jnp.bfloat16)
        w_hh = u(keys[4 * l + 1], (hidden, 4 * hidden), bound, jnp.bfloat16)
        b = (u(keys[4 * l + 2], (1, 4 * hidden), bound)
             + u(keys[4 * l + 3], (1, 4 * hidden), bound))
        lstm.append((w_ih, w_hh, b))
    fc_bound = 1.0 / float(hidden + action_dim) ** 0.5
    w_h = u(keys[-3], (1, hidden), fc_bound)
    w_a = u(keys[-2], (1, max(action_dim, 1)), fc_bound)
    b_fc = u(keys[-1], (1, 1), fc_bound)
    return {"lstm": lstm, "w_h": w_h, "w_a": w_a, "b_fc": b_fc}


def recurrent_critic_reference(s, a, params):
    """Plain-JAX reference of the same forward pass (mirrors the bf16 matmul operands, so it
    validates the kernel; expect small divergence vs. a pure-fp32 PyTorch LSTM)."""
    s = jnp.asarray(s, jnp.float32)
    B, T, _ = s.shape
    x_seq = s
    for (w_ih, w_hh, b) in params["lstm"]:
        H = w_hh.shape[0]
        h = jnp.zeros((B, H), jnp.float32)
        c = jnp.zeros((B, H), jnp.float32)
        outs = []
        for t in range(T):
            x_t = x_seq[:, t, :]
            gates = (
                jnp.dot(x_t.astype(jnp.bfloat16), w_ih, preferred_element_type=jnp.float32)
                + jnp.dot(h.astype(jnp.bfloat16), w_hh, preferred_element_type=jnp.float32)
                + b
            )
            i = jax.nn.sigmoid(gates[:, :H])
            f = jax.nn.sigmoid(gates[:, H:2 * H])
            g = jnp.tanh(gates[:, 2 * H:3 * H])
            o = jax.nn.sigmoid(gates[:, 3 * H:4 * H])
            c = f * c + i * g
            h = o * jnp.tanh(c)
            outs.append(h)
        x_seq = jnp.stack(outs, axis=1)
    feat = x_seq[:, -1, :]
    q = jnp.sum(feat * params["w_h"], axis=-1, keepdims=True)
    if a is not None:
        a_mat = jnp.asarray(a, jnp.float32).reshape(B, -1)
        q = q + jnp.sum(a_mat * params["w_a"], axis=-1, keepdims=True)
    return q + params["b_fc"]


# --------------------------------------- demo ---------------------------------------


if __name__ == "__main__":
    key = jax.random.PRNGKey(0)
    k_s, k_a, k_p = jax.random.split(key, 3)

    # Shapes consistent with the module: state_shape=(16,), action_shape=(4,),
    # seq len 8, batch 2, hidden_layer_size=128 (module default), layer_num=2.
    B, T = 2, 8
    state_dim, action_dim = 16, 4
    hidden, layer_num = 128, 2

    s = jax.random.normal(k_s, (B, T, state_dim), jnp.float32)
    a = jax.random.normal(k_a, (B, action_dim), jnp.float32)
    params = init_params(k_p, state_dim, action_dim, hidden, layer_num)

    q = recurrent_critic_forward(s, a, params)
    q = jax.block_until_ready(q)

    q_ref = recurrent_critic_reference(s, a, params)
    assert q.shape == (B, 1), q.shape
    assert jnp.allclose(q, q_ref, atol=1e-3, rtol=1e-3), (q, q_ref)

    print("KERNEL_OK")
</pallas_src>

<mosaic_0001>
module attributes {stable_mosaic.version = 11 : i64} {
  func.func @input_gates_kernel(%arg0: i32, %arg1: memref<64x16xf32, #tpu.memory_space<vmem>>, %arg2: memref<16x512xbf16, #tpu.memory_space<vmem>>, %arg3: memref<1x512xf32, #tpu.memory_space<vmem>>, %arg4: memref<64x512xf32, #tpu.memory_space<vmem>>) attributes {dimension_semantics = [#tpu.dimension_semantics<parallel>], iteration_bounds = array<i64: 1>, scalar_prefetch = 0 : i64, scratch_operands = 0 : i64, tpu.core_type = #tpu.core_type<tc>, window_params = [{transform_indices = @transform_0, window_bounds = array<i64: 64, 16>}, {pipeline_mode = #tpu.pipeline_mode<synchronous>, transform_indices = @transform_1, window_bounds = array<i64: 16, 512>}, {pipeline_mode = #tpu.pipeline_mode<synchronous>, transform_indices = @transform_2, window_bounds = array<i64: 1, 512>}, {transform_indices = @transform_3, window_bounds = array<i64: 64, 512>}]} {
    %c0 = arith.constant 0 : index
    %c0_0 = arith.constant 0 : index
    %0 = vector.load %arg1[%c0, %c0_0] : memref<64x16xf32, #tpu.memory_space<vmem>>, vector<64x16xf32>
    %1 = arith.truncf %0 : vector<64x16xf32> to vector<64x16xbf16>
    %c0_1 = arith.constant 0 : index
    %c0_2 = arith.constant 0 : index
    %2 = vector.load %arg2[%c0_1, %c0_2] : memref<16x512xbf16, #tpu.memory_space<vmem>>, vector<16x512xbf16>
    %cst = arith.constant dense<0.000000e+00> : vector<64x512xf32>
    %3 = tpu.matmul %1, %2, %cst {dimension_numbers = #tpu.dot_dimension_numbers<[1], [0], [0], [1], [0, 0, 1, 1], [], []>} : vector<64x16xbf16>, vector<16x512xbf16>, vector<64x512xf32> -> vector<64x512xf32>
    %c0_3 = arith.constant 0 : index
    %c0_4 = arith.constant 0 : index
    %4 = vector.load %arg3[%c0_3, %c0_4] : memref<1x512xf32, #tpu.memory_space<vmem>>, vector<1x512xf32>
    %5 = vector.broadcast %4 : vector<1x512xf32> to vector<64x512xf32>
    %6 = arith.addf %3, %5 : vector<64x512xf32>
    %c0_5 = arith.constant 0 : index
    %c0_6 = arith.constant 0 : index
    %7 = vector.load %arg4[%c0_5, %c0_6] : memref<64x512xf32, #tpu.memory_space<vmem>>, vector<64x512xf32>
    tpu.vector_store %arg4[%c0_5, %c0_6], %6 {strides = array<i32>} : memref<64x512xf32, #tpu.memory_space<vmem>>, vector<64x512xf32>,
    return
  }
  func.func @transform_0(%arg0: i32) -> (i32, i32) {
    %c0_i32 = arith.constant 0 : i32
    %c0_i32_0 = arith.constant 0 : i32
    return %arg0, %c0_i32 : i32, i32
  }
  func.func @transform_1(%arg0: i32) -> (i32, i32) {
    %c0_i32 = arith.constant 0 : i32
    %c0_i32_0 = arith.constant 0 : i32
    %c0_i32_1 = arith.constant 0 : i32
    return %c0_i32, %c0_i32_0 : i32, i32
  }
  func.func @transform_2(%arg0: i32) -> (i32, i32) {
    %c0_i32 = arith.constant 0 : i32
    %c0_i32_0 = arith.constant 0 : i32
    %c0_i32_1 = arith.constant 0 : i32
    return %c0_i32, %c0_i32_0 : i32, i32
  }
  func.func @transform_3(%arg0: i32) -> (i32, i32) {
    %c0_i32 = arith.constant 0 : i32
    %c0_i32_0 = arith.constant 0 : i32
    return %arg0, %c0_i32 : i32, i32
  }
}

</mosaic_0001>

<bundles_post_ra>
// kernel: tpu_custom_call.1
= control target key start
LH: loop header
LB: loop body
LE: loop exit
PB: predicated region body
PF: predicated region fallthrough
CT: control target
= control target key end

     0   :  { %v327_v2 = vmov 0   ;;  %vm74_vm0 = vcmask 130048   ;;  %s450_s0 = inlined_call_operand.vmem [shape: f32[64,16], index: 0, kind: input, shape index: {}]   ;;  %s451_s1 = inlined_call_operand.vmem [shape: bf16[16,512], index: 1, kind: input, shape index: {}]   ;;  %s452_s2 = inlined_call_operand.vmem [shape: f32[1,512], index: 2, kind: input, shape index: {}]   ;;  %s453_s3 = inlined_call_operand.hbm [shape: f32[64,512], index: 3, kind: output, shape index: {}]  }
   0x1   :  { %v297_v0 = vld [vmem:[%s451_s1 + $0x4] ss:$16 sps:$4 sm:$0xff]   ;;  %v299_v1 = vld [vmem:[%s451_s1 + $0xc] ss:$16 sps:$4 sm:$0xff]   ;;  %119 = vmatprep.mubr.bf16.mxu0 %v327_v2  ;;  %192 = vmatprep.mubr.bf16.mxu1 %v327_v2  ;;  %v301_v3 = vld [vmem:[%s451_s1] ss:$16 sps:$4 sm:$0xff]  }
   0x2   :  { %87 = vmatprep.subr.bf16.mxu0 %v297_v0  ;;  %v302_v4 = vld [vmem:[%s451_s1 + $0x8] ss:$16 sps:$4 sm:$0xff]   ;;  %v16_v5 = vld [vmem:[%s450_s0] sm:$0xff]  ;;  %160 = vmatprep.subr.bf16.mxu1 %v299_v1 }
   0x3   :  { %v17_v6 = vld [vmem:[%s450_s0 + $0x8] sm:$0xff]  ;;  %88 = vmatpush1.bf16.msra.mxu0 %v301_v3  ;;  %161 = vmatpush1.bf16.msra.mxu1 %v302_v4 }
   0x4   :  { %v24_v7 = vpack.c.bf16 %v17_v6, %v16_v5 }
   0x5   :  { %8 = vsyncpa [#allocation3], 0  ;;  %v18_v8 = vld [vmem:[%s450_s0 + $0x10] sm:$0xff]  ;;  %v19_v9 = vld [vmem:[%s450_s0 + $0x18] sm:$0xff]  ;;  %v34_v17 = vlaneseq }
   0x6   :  { %285 = vmatmul.mubr.msk.bf16.vlgmr.msra.gmra.mrb[0].mxu0 %vm74_vm0, %v24_v7  ;;  %289 = vmatmul.mubr.msk.bf16.vlgmr.msra.gmra.mrb[0].mxu1 %vm74_vm0, %v24_v7  ;;  %v25_v10 = vpack.c.bf16 %v19_v9, %v18_v8  ;;  %v20_v11 = vld [vmem:[%s450_s0 + $0x20] sm:$0xff]  ;;  %v21_v12 = vld [vmem:[%s450_s0 + $0x28] sm:$0xff]  ;;  %v22_v14 = vld [vmem:[%s450_s0 + $0x30] sm:$0xff] }
   0x7   :  { %129 = vmatprep.mubr.bf16.mxu0 %v327_v2  ;;  %202 = vmatprep.mubr.bf16.mxu1 %v327_v2  ;;  %v26_v13 = vpack.c.bf16 %v21_v12, %v20_v11  ;;  %v23_v15 = vld [vmem:[%s450_s0 + $0x38] sm:$0xff]  ;;  %v35_v18 = vshrl.u32 %v34_v17, 7  ;;  %v32_v21 = vld [vmem:[%s452_s2] sm:$0xf]  ;;  %s328_s0 = smov [#allocation2]  }
   0x8   :  { %v27_v16 = vpack.c.bf16 %v23_v15, %v22_v14  ;;  %s270_s2 = sshll.u32 %s328_s0, 4  ;;  %s271_s2 = int_to_ptr.vmem [resolvable:$true] %s270_s2 }
   0x9   :  { %v36_v19 = vsub.s32 0, %v35_v18  ;;  %v44_v20 = vsub.s32 2, %v35_v18  ;;  %v40_v22 = vsub.s32 1, %v35_v18  ;;  %v48_v23 = vsub.s32 3, %v35_v18  ;;  %s303_s10 = scalar_lea.vmem %s271_s2, 4096  ;;  %p308_p1 = scmp.lt.s32.totalorder %s271_s2, %s271_s2 }
   0xa   :  { %p304_p0 = scmp.ne.s32.totalorder %s271_s2, %s303_s10  ;;  %p309_p2 = scmp.lt.s32.totalorder %s303_s10, %s303_s10 }
   0xb   :  { %v398_v24 = vrot.slane %v32_v21, %v36_v19  ;;  %v400_v25 = vrot.slane %v32_v21, %v44_v20  ;;  %v402_v26 = vrot.slane %v32_v21, %v40_v22  ;;  %v404_v27 = vrot.slane %v32_v21, %v48_v23 }
   0xc   :  { %p310_p3 = por %p309_p2, %p308_p1 }
   0xe   :  { %286 = vmatmul.mubr.msk.bf16.gmra.mrb[4].mxu0 %vm74_vm0, %v25_v10  ;;  %290 = vmatmul.mubr.msk.bf16.gmra.mrb[4].mxu1 %vm74_vm0, %v25_v10  ;;  %p311_p4 = pnand %p310_p3, %p304_p0 }
   0xf   :  { %139 = vmatprep.mubr.bf16.mxu0 %v327_v2  ;;  %212 = vmatprep.mubr.bf16.mxu1 %v327_v2 }
  0x16   :  { %287 = vmatmul.mubr.msk.bf16.gmra.mrb[8].mxu0 %vm74_vm0, %v26_v13  ;;  %291 = vmatmul.mubr.msk.bf16.gmra.mrb[8].mxu1 %vm74_vm0, %v26_v13 }
  0x17   :  { %149 = vmatprep.mubr.bf16.mxu0 %v327_v2  ;;  %222 = vmatprep.mubr.bf16.mxu1 %v327_v2 }
  0x1e   :  { %288 = vmatmul.mubr.msk.bf16.gmra.mrb[12].mxu0 %vm74_vm0, %v27_v16  ;;  %292 = vmatmul.mubr.msk.bf16.gmra.mrb[12].mxu1 %vm74_vm0, %v27_v16 }
  0xd9   :  { %v121_v28 = vpop.f32.mrb[0].mxu0  ;;  %v194_v29 = vpop.f32.mrb[0].mxu1 }
  0xda   :  { %v122_v30 = vadd.f32 %v121_v28, %v398_v24  ;;  %v195_v31 = vadd.f32 %v194_v29, %v400_v25  ;;  %v123_v32 = vpop.f32.mrb[1].mxu0  ;;  %v196_v33 = vpop.f32.mrb[1].mxu1 }
  0xdb   :  { %v124_v34 = vadd.f32 %v123_v32, %v402_v26  ;;  %v197_v35 = vadd.f32 %v196_v33, %v404_v27  ;;  %v125_v36 = vpop.f32.mrb[2].mxu0  ;;  %v198_v37 = vpop.f32.mrb[2].mxu1 }
  0xdc   :  { %233 = vst [vmem:[#allocation2] sm:$0xff] %v122_v30  ;;  %235 = vst [vmem:[#allocation2 + $0x10] sm:$0xff] %v195_v31  ;;  %v126_v38 = vadd.f32 %v125_v36, %v398_v24  ;;  %v199_v39 = vadd.f32 %v198_v37, %v400_v25  ;;  %v127_v40 = vpop.f32.mrb[3].mxu0  ;;  %v200_v41 = vpop.f32.mrb[3].mxu1 }
  0xdd   :  { %234 = vst [vmem:[#allocation2 + $0x8] sm:$0xff] %v124_v34  ;;  %236 = vst [vmem:[#allocation2 + $0x18] sm:$0xff] %v197_v35  ;;  %v128_v42 = vadd.f32 %v127_v40, %v402_v26  ;;  %v201_v43 = vadd.f32 %v200_v41, %v404_v27 }
  0xde   :  { %237 = vst [vmem:[#allocation2 + $0x20] sm:$0xff] %v126_v38  ;;  %239 = vst [vmem:[#allocation2 + $0x30] sm:$0xff] %v199_v39 }
  0xdf   :  { %238 = vst [vmem:[#allocation2 + $0x28] sm:$0xff] %v128_v42  ;;  %240 = vst [vmem:[#allocation2 + $0x38] sm:$0xff] %v201_v43 }
  0xe1   :  { %v131_v44 = vpop.f32.mrb[4].mxu0  ;;  %v204_v45 = vpop.f32.mrb[4].mxu1 }
  0xe2   :  { %v132_v46 = vadd.f32 %v131_v44, %v398_v24  ;;  %v205_v47 = vadd.f32 %v204_v45, %v400_v25  ;;  %v133_v48 = vpop.f32.mrb[5].mxu0  ;;  %v206_v49 = vpop.f32.mrb[5].mxu1 }
  0xe3   :  { %v134_v50 = vadd.f32 %v133_v48, %v402_v26  ;;  %v207_v51 = vadd.f32 %v206_v49, %v404_v27  ;;  %v135_v52 = vpop.f32.mrb[6].mxu0  ;;  %v208_v53 = vpop.f32.mrb[6].mxu1 }
  0xe4   :  { %241 = vst [vmem:[#allocation2 + $0x40] sm:$0xff] %v132_v46  ;;  %243 = vst [vmem:[#allocation2 + $0x50] sm:$0xff] %v205_v47  ;;  %v136_v54 = vadd.f32 %v135_v52, %v398_v24  ;;  %v209_v55 = vadd.f32 %v208_v53, %v400_v25  ;;  %v137_v56 = vpop.f32.mrb[7].mxu0  ;;  %v210_v57 = vpop.f32.mrb[7].mxu1 }
  0xe5   :  { %242 = vst [vmem:[#allocation2 + $0x48] sm:$0xff] %v134_v50  ;;  %244 = vst [vmem:[#allocation2 + $0x58] sm:$0xff] %v207_v51  ;;  %v138_v58 = vadd.f32 %v137_v56, %v402_v26  ;;  %v211_v59 = vadd.f32 %v210_v57, %v404_v27 }
  0xe6   :  { %245 = vst [vmem:[#allocation2 + $0x60] sm:$0xff] %v136_v54  ;;  %247 = vst [vmem:[#allocation2 + $0x70] sm:$0xff] %v209_v55 }
  0xe7   :  { %246 = vst [vmem:[#allocation2 + $0x68] sm:$0xff] %v138_v58  ;;  %248 = vst [vmem:[#allocation2 + $0x78] sm:$0xff] %v211_v59 }
  0xe9   :  { %v141_v60 = vpop.f32.mrb[8].mxu0  ;;  %v214_v61 = vpop.f32.mrb[8].mxu1 }
  0xea   :  { %v142_v62 = vadd.f32 %v141_v60, %v398_v24  ;;  %v215_v63 = vadd.f32 %v214_v61, %v400_v25  ;;  %v143_v0 = vpop.f32.mrb[9].mxu0  ;;  %v216_v1 = vpop.f32.mrb[9].mxu1 }
  0xeb   :  { %v144_v2 = vadd.f32 %v143_v0, %v402_v26  ;;  %v217_v3 = vadd.f32 %v216_v1, %v404_v27  ;;  %v145_v4 = vpop.f32.mrb[10].mxu0  ;;  %v218_v5 = vpop.f32.mrb[10].mxu1 }
  0xec   :  { %249 = vst [vmem:[#allocation2 + $0x80] sm:$0xff] %v142_v62  ;;  %251 = vst [vmem:[#allocation2 + $0x90] sm:$0xff] %v215_v63  ;;  %v146_v6 = vadd.f32 %v145_v4, %v398_v24  ;;  %v219_v7 = vadd.f32 %v218_v5, %v400_v25  ;;  %v147_v8 = vpop.f32.mrb[11].mxu0  ;;  %v220_v9 = vpop.f32.mrb[11].mxu1 }
  0xed   :  { %250 = vst [vmem:[#allocation2 + $0x88] sm:$0xff] %v144_v2  ;;  %252 = vst [vmem:[#allocation2 + $0x98] sm:$0xff] %v217_v3  ;;  %v148_v10 = vadd.f32 %v147_v8, %v402_v26  ;;  %v221_v11 = vadd.f32 %v220_v9, %v404_v27 }
  0xee   :  { %253 = vst [vmem:[#allocation2 + $0xa0] sm:$0xff] %v146_v6  ;;  %255 = vst [vmem:[#allocation2 + $0xb0] sm:$0xff] %v219_v7 }
  0xef   :  { %254 = vst [vmem:[#allocation2 + $0xa8] sm:$0xff] %v148_v10  ;;  %256 = vst [vmem:[#allocation2 + $0xb8] sm:$0xff] %v221_v11 }
  0xf1   :  { %v151_v12 = vpop.f32.mrb[12].mxu0  ;;  %v224_v13 = vpop.f32.mrb[12].mxu1 }
  0xf2   :  { %v152_v14 = vadd.f32 %v151_v12, %v398_v24  ;;  %v225_v15 = vadd.f32 %v224_v13, %v400_v25  ;;  %v153_v16 = vpop.f32.mrb[13].mxu0  ;;  %v226_v17 = vpop.f32.mrb[13].mxu1 }
  0xf3   :  { %v154_v18 = vadd.f32 %v153_v16, %v402_v26  ;;  %v227_v19 = vadd.f32 %v226_v17, %v404_v27  ;;  %v155_v20 = vpop.f32.mrb[14].mxu0  ;;  %v228_v21 = vpop.f32.mrb[14].mxu1 }
  0xf4   :  { %257 = vst [vmem:[#allocation2 + $0xc0] sm:$0xff] %v152_v14  ;;  %259 = vst [vmem:[#allocation2 + $0xd0] sm:$0xff] %v225_v15  ;;  %v156_v22 = vadd.f32 %v155_v20, %v398_v24  ;;  %v229_v23 = vadd.f32 %v228_v21, %v400_v25  ;;  %v157_v28 = vpop.f32.mrb[15].mxu0  ;;  %v230_v29 = vpop.f32.mrb[15].mxu1 }
  0xf5   :  { %258 = vst [vmem:[#allocation2 + $0xc8] sm:$0xff] %v154_v18  ;;  %260 = vst [vmem:[#allocation2 + $0xd8] sm:$0xff] %v227_v19  ;;  %v158_v30 = vadd.f32 %v157_v28, %v402_v26  ;;  %v231_v31 = vadd.f32 %v230_v29, %v404_v27 }
  0xf6   :  { %261 = vst [vmem:[#allocation2 + $0xe0] sm:$0xff] %v156_v22  ;;  %263 = vst [vmem:[#allocation2 + $0xf0] sm:$0xff] %v229_v23 }
  0xf7   :  { %262 = vst [vmem:[#allocation2 + $0xe8] sm:$0xff] %v158_v30  ;;  %264 = vst [vmem:[#allocation2 + $0xf8] sm:$0xff] %v231_v31 }
  0xf8   :  { %314 = shalt.err (!%p311_p4)
}
  0xf9   :  { %s315_s13 = scalar_lea.hbm %s453_s3, 4096 }
  0xfa   :  { %p316_p5 = scmp.ne.s32.totalorder %s453_s3, %s315_s13  ;;  %p319_p6 = scmp.lt.u32.totalorder %s315_s13, %s453_s3 }
  0xfc   :  { %p321_p7 = pnand %p319_p6, %p316_p5 }
  0xfe   :  { %324 = shalt.err (!%p321_p7)
}
  0xff   :  { %s329_s18 = smov 512   ;;  %s330_s19 = smov 32  }
 0x100   :  { %276 = dma.vmem_to_hbm [thread:$0]  %s271_s2, 4096, %s453_s3, [#allocation3], %s329_s18, %s329_s18, %s330_s19  }
 0x101   :  { %325 = dma.done.wait [#allocation3], 4096  }
 0x102   :  { %326 = vsyncadd [#allocation3], 4294963200 }
 0x103   :  { %280 = vsyncpa [#allocation3], 1 }

</bundles_post_ra>
